<compile_context>
chip_gen: v5e
topology: v5e:2x2
jax: 0.10.0
libtpu: 0.0.40
codegen_flags: <defaults>
</compile_context>

<pallas_src>
import functools
import math

import jax
import jax.numpy as jnp
from jax.experimental import pallas as pl
from jax.experimental.pallas import tpu as pltpu


def _layer_norm(x, gamma, beta, eps):
    """LayerNorm over the last dim (biased variance, like torch.nn.LayerNorm)."""
    mu = jnp.mean(x, axis=-1, keepdims=True)
    xc = x - mu
    var = jnp.mean(xc * xc, axis=-1, keepdims=True)
    return xc * jax.lax.rsqrt(var + eps) * gamma + beta


def _encoder_layer_kernel(q_ref, k_ref, v_ref, wqkv_ref, pos_ref, fcw_ref,
                          l1w_ref, l1b_ref, l2w_ref, vecs_ref, out_ref,
                          *, eps, compute_dtype):
    f32 = jnp.float32
    cdt = compute_dtype

    B, n, d_inp = q_ref.shape                    # batch_block, seq, d_inp
    n_heads = wqkv_ref.shape[1]
    d_head = wqkv_ref.shape[3]
    r = B * n                                    # rows per grid step
    G = n_heads * B                              # attention batch (heads x batch)

    # Flatten rows so the projections / FFN / LayerNorms see one tall matmul.
    q_res = q_ref[...].astype(f32).reshape(r, d_inp)      # f32 kept for residual
    q2 = q_res.astype(cdt)
    k2 = k_ref[...].astype(cdt).reshape(r, d_inp)
    v2 = v_ref[...].astype(cdt).reshape(r, d_inp)

    wq = wqkv_ref[0]                             # (h, d_inp, d_head), bf16
    wk = wqkv_ref[1]
    wv = wqkv_ref[2]

    def project(x2, w):
        # Heads-batched projection: one leading-batch dot_general, no lane slices.
        xb = jnp.broadcast_to(x2[None], (n_heads, r, d_inp))
        y = jnp.einsum('hrd,hdk->hrk', xb, w, preferred_element_type=f32)
        # (h, B*n, dh) -> (h*B, n, dh); g = head * B + b
        return y.reshape(G, n, d_head).astype(cdt)

    Qg = project(q2, wq)                         # 1/sqrt(d_head) folded into wq
    Kg = project(k2, wk)
    Vg = project(v2, wv)

    # Heads-and-batch batched attention (flash-style einsum patterns).
    e = jnp.einsum('gid,gjd->gij', Qg, Kg, preferred_element_type=f32)
    e = e.reshape(n_heads, B, n, n) + pos_ref[...][:, None, :, :]
    e = e - jnp.max(e, axis=-1, keepdims=True)
    p = jnp.exp(e)
    a = p * pl.reciprocal(jnp.sum(p, axis=-1, keepdims=True), approx=True)
    a = a.reshape(G, n, n).astype(cdt)

    o = jnp.einsum('gij,gjd->gid', a, Vg, preferred_element_type=f32)  # (G, n, dh)

    # Output projection folded per head: fc(concat_h o_h) == sum_h o_h @ Wfc_h.
    fcw_g = jnp.broadcast_to(fcw_ref[...][:, None], (n_heads, B, d_head, d_inp))
    fcw_g = fcw_g.reshape(G, d_head, d_inp)
    mh = jnp.einsum('gid,gdm->gim', o.astype(cdt), fcw_g,
                    preferred_element_type=f32)
    mh = jnp.sum(mh.reshape(n_heads, B, n, d_inp), axis=0).reshape(r, d_inp)

    vecs = vecs_ref[...]                          # packed (8, d_inp) constants
    fc_b, n1_g, n1_b = vecs[0:1], vecs[1:2], vecs[2:3]
    n3_g, n3_b, l2_b = vecs[3:4], vecs[4:5], vecs[5:6]

    # Residual + norm1 (dropout1 identity in eval mode).
    x = mh + fc_b + q_res
    x = _layer_norm(x, n1_g, n1_b, eps)

    # FFN: linear1 -> ReLU -> linear2, residual, norm3 (dropout3/4 identity).
    h1 = jnp.einsum('rd,df->rf', x.astype(cdt), l1w_ref[...],
                    preferred_element_type=f32)
    h1 = jnp.maximum(h1 + l1b_ref[...], 0.0)
    y = jnp.einsum('rf,fd->rd', h1.astype(cdt), l2w_ref[...],
                   preferred_element_type=f32)
    x = x + y + l2_b
    x = _layer_norm(x, n3_g, n3_b, eps)

    out_ref[...] = x.reshape(B, n, d_inp).astype(out_ref.dtype)


def prepare_params(params, *, n_heads, compute_dtype=jnp.bfloat16):
    """One-time packing / transposition / casting of the PyTorch-layout weights."""
    f32 = jnp.float32
    hid, d_inp = params["wq"].shape
    assert hid % n_heads == 0
    d_head = hid // n_heads
    d_ffn = params["lin1_w"].shape[0]
    inv_scale = 1.0 / math.sqrt(d_head)

    def head_major(w):   # (hid, d_inp) -> (n_heads, d_inp, d_head)
        return jnp.transpose(w.reshape(n_heads, d_head, d_inp), (0, 2, 1))

    wq = (head_major(params["wq"]) * inv_scale).astype(compute_dtype)
    wk = head_major(params["wk"]).astype(compute_dtype)
    wv = head_major(params["wv"]).astype(compute_dtype)
    wqkv = jnp.stack([wq, wk, wv], axis=0)                 # (3, h, d_inp, d_head)

    # fc: (d_inp, hid) -> per-head (h, d_head, d_inp)
    fcw = jnp.transpose(params["fc_w"].reshape(d_inp, n_heads, d_head),
                        (1, 2, 0)).astype(compute_dtype)
    l1w = jnp.transpose(params["lin1_w"]).astype(compute_dtype)   # (d_inp, d_ffn)
    l2w = jnp.transpose(params["lin2_w"]).astype(compute_dtype)   # (d_ffn, d_inp)
    l1b = params["lin1_b"].reshape(1, d_ffn).astype(f32)

    vecs = jnp.zeros((8, d_inp), f32)
    vecs = (vecs.at[0].set(params["fc_b"].astype(f32))
                 .at[1].set(params["norm1_g"].astype(f32))
                 .at[2].set(params["norm1_b"].astype(f32))
                 .at[3].set(params["norm3_g"].astype(f32))
                 .at[4].set(params["norm3_b"].astype(f32))
                 .at[5].set(params["lin2_b"].astype(f32)))

    return dict(wqkv=wqkv, fcw=fcw, l1w=l1w, l1b=l1b, l2w=l2w, vecs=vecs,
                pos=params["pos"].astype(f32),
                n_heads=n_heads, d_head=d_head, d_ffn=d_ffn,
                d_inp=d_inp, compute_dtype=compute_dtype)


def transformer_encoder_layer(query, key, value, prepared, *,
                              eps=1e-5, batch_block=None):
    """Matches TransformerEncoderLayer.forward in eval mode."""
    b, n, d_inp = query.shape
    assert d_inp == prepared["d_inp"]
    n_heads = prepared["n_heads"]
    d_head = prepared["d_head"]
    d_ffn = prepared["d_ffn"]
    cdt = prepared["compute_dtype"]

    if batch_block is None:
        # Largest divisor of b keeping ~<=256 rows per grid step (amortize the
        # per-step overhead while leaving a multi-step "parallel" grid for
        # large batches so both v7x TensorCores stay busy).
        batch_block = 1
        for cand in range(1, b + 1):
            if b % cand == 0 and cand * n <= 256:
                batch_block = cand
    assert b % batch_block == 0
    grid = (b // batch_block,)

    def const_spec(shape):
        nd = len(shape)
        return pl.BlockSpec(shape, lambda i, _nd=nd: (0,) * _nd)

    seq_spec = pl.BlockSpec((batch_block, n, d_inp), lambda i: (i, 0, 0))

    kernel = functools.partial(_encoder_layer_kernel, eps=eps, compute_dtype=cdt)

    out = pl.pallas_call(
        kernel,
        out_shape=jax.ShapeDtypeStruct((b, n, d_inp), query.dtype),
        grid=grid,
        in_specs=[
            seq_spec, seq_spec, seq_spec,                    # query, key, value
            const_spec((3, n_heads, d_inp, d_head)),         # packed wq/wk/wv
            const_spec((n_heads, n, n)),                     # pos_embed
            const_spec((n_heads, d_head, d_inp)),            # fc weight (per head)
            const_spec((d_inp, d_ffn)),                      # lin1_w
            const_spec((1, d_ffn)),                          # lin1_b
            const_spec((d_ffn, d_inp)),                      # lin2_w
            const_spec((8, d_inp)),                          # packed bias/LN vectors
        ],
        out_specs=pl.BlockSpec((batch_block, n, d_inp), lambda i: (i, 0, 0)),
        compiler_params=pltpu.CompilerParams(
            dimension_semantics=("parallel",)),
    )(query, key, value, prepared["wqkv"], prepared["pos"], prepared["fcw"],
      prepared["l1w"], prepared["l1b"], prepared["l2w"], prepared["vecs"])
    return out


# ----------------------------------------------------------------------------
# Pure-JAX f32 reference mirroring the PyTorch module (eval mode).
# ----------------------------------------------------------------------------
def _reference(query, key, value, p, *, n_heads, eps=1e-5):
    def linear(x, w, b=None):
        y = x @ w.T
        return y if b is None else y + b

    def ln(x, g, b):
        mu = jnp.mean(x, axis=-1, keepdims=True)
        var = jnp.mean((x - mu) ** 2, axis=-1, keepdims=True)
        return (x - mu) / jnp.sqrt(var + eps) * g + b

    bsz, n, _ = query.shape
    hid = p["wq"].shape[0]
    d = hid // n_heads
    scale = math.sqrt(d)

    Q = linear(query, p["wq"])
    K = linear(key, p["wk"])
    V = linear(value, p["wv"])

    def split(x):  # b n (h d) -> b h n d
        return jnp.transpose(x.reshape(bsz, n, n_heads, d), (0, 2, 1, 3))

    Qh, Kh, Vh = split(Q), split(K), split(V)
    energy = jnp.einsum("bhid,bhjd->bhij", Qh, Kh) / scale + p["pos"][None]
    attn = jax.nn.softmax(energy, axis=-1)
    out = jnp.einsum("bhij,bhjd->bhid", attn, Vh)
    out = jnp.transpose(out, (0, 2, 1, 3)).reshape(bsz, n, hid)
    out = linear(out, p["fc_w"], p["fc_b"])

    x = out + query                       # dropout1 identity (eval)
    x = ln(x, p["norm1_g"], p["norm1_b"])
    h2 = jax.nn.relu(linear(x, p["lin1_w"], p["lin1_b"]))
    y = linear(h2, p["lin2_w"], p["lin2_b"])
    x = x + y                             # dropout3/4 identity (eval)
    x = ln(x, p["norm3_g"], p["norm3_b"])
    return x


if __name__ == "__main__":
    B, N, D_INP = 2, 8, 32            # batch, sequence length (= n_k), d_inp
    N_HEADS, D_MODEL = 4, 8           # d_out = hid = n_heads * d_model
    HID = N_HEADS * D_MODEL
    D_FFN = 64

    key = jax.random.PRNGKey(0)
    ks = jax.random.split(key, 14)
    s = 0.1

    query = jax.random.normal(ks[0], (B, N, D_INP), jnp.float32)
    key_in = jax.random.normal(ks[1], (B, N, D_INP), jnp.float32)
    value = jax.random.normal(ks[2], (B, N, D_INP), jnp.float32)

    params = dict(
        wq=s * jax.random.normal(ks[3], (HID, D_INP), jnp.float32),
        wk=s * jax.random.normal(ks[4], (HID, D_INP), jnp.float32),
        wv=s * jax.random.normal(ks[5], (HID, D_INP), jnp.float32),
        fc_w=s * jax.random.normal(ks[6], (D_INP, HID), jnp.float32),
        fc_b=s * jax.random.normal(ks[7], (D_INP,), jnp.float32),
        pos=s * jax.random.normal(ks[8], (N_HEADS, N, N), jnp.float32),
        norm1_g=1.0 + s * jax.random.normal(ks[9], (D_INP,), jnp.float32),
        norm1_b=s * jax.random.normal(ks[10], (D_INP,), jnp.float32),
        lin1_w=s * jax.random.normal(ks[11], (D_FFN, D_INP), jnp.float32),
        lin1_b=s * jax.random.normal(ks[12], (D_FFN,), jnp.float32),
        lin2_w=s * jax.random.normal(ks[13], (D_INP, D_FFN), jnp.float32),
        lin2_b=jnp.zeros((D_INP,), jnp.float32),
        norm3_g=jnp.ones((D_INP,), jnp.float32),
        norm3_b=jnp.zeros((D_INP,), jnp.float32),
    )

    prepared = prepare_params(params, n_heads=N_HEADS)   # one-time pack/cast
    out = transformer_encoder_layer(query, key_in, value, prepared)
    out = jax.block_until_ready(out)

    ref = _reference(query, key_in, value, params, n_heads=N_HEADS)

    # Tolerance reflects bf16 MXU operands (f32 accumulation & f32 epilogue).
    if not jnp.allclose(out, ref, atol=3e-2, rtol=3e-2):
        err = float(jnp.max(jnp.abs(out - ref)))
        raise AssertionError(f"Pallas TransformerEncoderLayer mismatch, max err {err}")

    print("KERNEL_OK")
</pallas_src>

<mosaic_0001>
module attributes {stable_mosaic.version = 11 : i64} {
  func.func @_encoder_layer_kernel(%arg0: i32, %arg1: memref<2x8x32xf32, #tpu.memory_space<vmem>>, %arg2: memref<2x8x32xf32, #tpu.memory_space<vmem>>, %arg3: memref<2x8x32xf32, #tpu.memory_space<vmem>>, %arg4: memref<3x4x32x8xbf16, #tpu.memory_space<vmem>>, %arg5: memref<4x8x8xf32, #tpu.memory_space<vmem>>, %arg6: memref<4x8x32xbf16, #tpu.memory_space<vmem>>, %arg7: memref<32x64xbf16, #tpu.memory_space<vmem>>, %arg8: memref<1x64xf32, #tpu.memory_space<vmem>>, %arg9: memref<64x32xbf16, #tpu.memory_space<vmem>>, %arg10: memref<8x32xf32, #tpu.memory_space<vmem>>, %arg11: memref<2x8x32xf32, #tpu.memory_space<vmem>>) attributes {dimension_semantics = [#tpu.dimension_semantics<parallel>], iteration_bounds = array<i64: 1>, scalar_prefetch = 0 : i64, scratch_operands = 0 : i64, tpu.core_type = #tpu.core_type<tc>, window_params = [{transform_indices = @transform_0, window_bounds = array<i64: 2, 8, 32>}, {transform_indices = @transform_1, window_bounds = array<i64: 2, 8, 32>}, {transform_indices = @transform_2, window_bounds = array<i64: 2, 8, 32>}, {pipeline_mode = #tpu.pipeline_mode<synchronous>, transform_indices = @transform_3, window_bounds = array<i64: 3, 4, 32, 8>}, {pipeline_mode = #tpu.pipeline_mode<synchronous>, transform_indices = @transform_4, window_bounds = array<i64: 4, 8, 8>}, {pipeline_mode = #tpu.pipeline_mode<synchronous>, transform_indices = @transform_5, window_bounds = array<i64: 4, 8, 32>}, {pipeline_mode = #tpu.pipeline_mode<synchronous>, transform_indices = @transform_6, window_bounds = array<i64: 32, 64>}, {pipeline_mode = #tpu.pipeline_mode<synchronous>, transform_indices = @transform_7, window_bounds = array<i64: 1, 64>}, {pipeline_mode = #tpu.pipeline_mode<synchronous>, transform_indices = @transform_8, window_bounds = array<i64: 64, 32>}, {pipeline_mode = #tpu.pipeline_mode<synchronous>, transform_indices = @transform_9, window_bounds = array<i64: 8, 32>}, {transform_indices = @transform_10, window_bounds = array<i64: 2, 8, 32>}]} {
    %c0 = arith.constant 0 : index
    %c0_0 = arith.constant 0 : index
    %c0_1 = arith.constant 0 : index
    %0 = vector.load %arg1[%c0, %c0_0, %c0_1] : memref<2x8x32xf32, #tpu.memory_space<vmem>>, vector<2x8x32xf32>
    %1 = vector.shape_cast %0 : vector<2x8x32xf32> to vector<16x32xf32>
    %2 = arith.truncf %1 : vector<16x32xf32> to vector<16x32xbf16>
    %c0_2 = arith.constant 0 : index
    %c0_3 = arith.constant 0 : index
    %c0_4 = arith.constant 0 : index
    %3 = vector.load %arg2[%c0_2, %c0_3, %c0_4] : memref<2x8x32xf32, #tpu.memory_space<vmem>>, vector<2x8x32xf32>
    %4 = arith.truncf %3 : vector<2x8x32xf32> to vector<2x8x32xbf16>
    %5 = vector.shape_cast %4 : vector<2x8x32xbf16> to vector<16x32xbf16>
    %c0_5 = arith.constant 0 : index
    %c0_6 = arith.constant 0 : index
    %c0_7 = arith.constant 0 : index
    %6 = vector.load %arg3[%c0_5, %c0_6, %c0_7] : memref<2x8x32xf32, #tpu.memory_space<vmem>>, vector<2x8x32xf32>
    %7 = arith.truncf %6 : vector<2x8x32xf32> to vector<2x8x32xbf16>
    %8 = vector.shape_cast %7 : vector<2x8x32xbf16> to vector<16x32xbf16>
    %c0_8 = arith.constant 0 : index
    %c0_9 = arith.constant 0 : index
    %c0_10 = arith.constant 0 : index
    %c0_11 = arith.constant 0 : index
    %9 = vector.load %arg4[%c0_8, %c0_9, %c0_10, %c0_11] : memref<3x4x32x8xbf16, #tpu.memory_space<vmem>>, vector<1x4x32x8xbf16>
    %10 = vector.shape_cast %9 : vector<1x4x32x8xbf16> to vector<4x32x8xbf16>
    %c1 = arith.constant 1 : index
    %c0_12 = arith.constant 0 : index
    %c0_13 = arith.constant 0 : index
    %c0_14 = arith.constant 0 : index
    %11 = vector.load %arg4[%c1, %c0_12, %c0_13, %c0_14] : memref<3x4x32x8xbf16, #tpu.memory_space<vmem>>, vector<1x4x32x8xbf16>
    %12 = vector.shape_cast %11 : vector<1x4x32x8xbf16> to vector<4x32x8xbf16>
    %c2 = arith.constant 2 : index
    %c0_15 = arith.constant 0 : index
    %c0_16 = arith.constant 0 : index
    %c0_17 = arith.constant 0 : index
    %13 = vector.load %arg4[%c2, %c0_15, %c0_16, %c0_17] : memref<3x4x32x8xbf16, #tpu.memory_space<vmem>>, vector<1x4x32x8xbf16>
    %14 = vector.shape_cast %13 : vector<1x4x32x8xbf16> to vector<4x32x8xbf16>
    %15 = vector.shape_cast %2 : vector<16x32xbf16> to vector<1x16x32xbf16>
    %16 = vector.shape_cast %15 : vector<1x16x32xbf16> to vector<1x16x32xbf16>
    %17 = vector.broadcast %16 : vector<1x16x32xbf16> to vector<4x16x32xbf16>
    "tpu.trace_start"() <{level = 10 : i32, message = "hrd,hdk->hrk"}> : () -> ()
    %cst = arith.constant dense<0.000000e+00> : vector<4x16x8xf32>
    %18 = tpu.matmul %17, %10, %cst {dimension_numbers = #tpu.dot_dimension_numbers<[2], [1], [1], [2], [0, 0, 0, 1, 1, 2], [0], [0]>} : vector<4x16x32xbf16>, vector<4x32x8xbf16>, vector<4x16x8xf32> -> vector<4x16x8xf32>
    "tpu.trace_stop"() : () -> ()
    %19 = vector.shape_cast %18 : vector<4x16x8xf32> to vector<8x8x8xf32>
    %20 = arith.truncf %19 : vector<8x8x8xf32> to vector<8x8x8xbf16>
    %21 = vector.shape_cast %5 : vector<16x32xbf16> to vector<1x16x32xbf16>
    %22 = vector.shape_cast %21 : vector<1x16x32xbf16> to vector<1x16x32xbf16>
    %23 = vector.broadcast %22 : vector<1x16x32xbf16> to vector<4x16x32xbf16>
    "tpu.trace_start"() <{level = 10 : i32, message = "hrd,hdk->hrk"}> : () -> ()
    %cst_18 = arith.constant dense<0.000000e+00> : vector<4x16x8xf32>
    %24 = tpu.matmul %23, %12, %cst_18 {dimension_numbers = #tpu.dot_dimension_numbers<[2], [1], [1], [2], [0, 0, 0, 1, 1, 2], [0], [0]>} : vector<4x16x32xbf16>, vector<4x32x8xbf16>, vector<4x16x8xf32> -> vector<4x16x8xf32>
    "tpu.trace_stop"() : () -> ()
    %25 = vector.shape_cast %24 : vector<4x16x8xf32> to vector<8x8x8xf32>
    %26 = arith.truncf %25 : vector<8x8x8xf32> to vector<8x8x8xbf16>
    %27 = vector.shape_cast %8 : vector<16x32xbf16> to vector<1x16x32xbf16>
    %28 = vector.shape_cast %27 : vector<1x16x32xbf16> to vector<1x16x32xbf16>
    %29 = vector.broadcast %28 : vector<1x16x32xbf16> to vector<4x16x32xbf16>
    "tpu.trace_start"() <{level = 10 : i32, message = "hrd,hdk->hrk"}> : () -> ()
    %cst_19 = arith.constant dense<0.000000e+00> : vector<4x16x8xf32>
    %30 = tpu.matmul %29, %14, %cst_19 {dimension_numbers = #tpu.dot_dimension_numbers<[2], [1], [1], [2], [0, 0, 0, 1, 1, 2], [0], [0]>} : vector<4x16x32xbf16>, vector<4x32x8xbf16>, vector<4x16x8xf32> -> vector<4x16x8xf32>
    "tpu.trace_stop"() : () -> ()
    %31 = vector.shape_cast %30 : vector<4x16x8xf32> to vector<8x8x8xf32>
    %32 = arith.truncf %31 : vector<8x8x8xf32> to vector<8x8x8xbf16>
    "tpu.trace_start"() <{level = 10 : i32, message = "gid,gjd->gij"}> : () -> ()
    %cst_20 = arith.constant dense<0.000000e+00> : vector<8x8x8xf32>
    %33 = tpu.matmul %20, %26, %cst_20 {dimension_numbers = #tpu.dot_dimension_numbers<[2], [2], [1], [1], [0, 0, 0, 1, 1, 1], [0], [0]>} : vector<8x8x8xbf16>, vector<8x8x8xbf16>, vector<8x8x8xf32> -> vector<8x8x8xf32>
    "tpu.trace_stop"() : () -> ()
    %34 = vector.shape_cast %33 : vector<8x8x8xf32> to vector<4x2x8x8xf32>
    %c0_21 = arith.constant 0 : index
    %c0_22 = arith.constant 0 : index
    %c0_23 = arith.constant 0 : index
    %35 = vector.load %arg5[%c0_21, %c0_22, %c0_23] : memref<4x8x8xf32, #tpu.memory_space<vmem>>, vector<4x8x8xf32>
    %36 = vector.shape_cast %35 : vector<4x8x8xf32> to vector<4x1x8x8xf32>
    %37 = vector.broadcast %36 : vector<4x1x8x8xf32> to vector<4x2x8x8xf32>
    %38 = arith.addf %34, %37 : vector<4x2x8x8xf32>
    %cst_24 = arith.constant dense<0xFF800000> : vector<4x2x8xf32>
    %39 = vector.multi_reduction <maximumf>, %38, %cst_24 [3] : vector<4x2x8x8xf32> to vector<4x2x8xf32>
    %40 = vector.shape_cast %39 : vector<4x2x8xf32> to vector<4x2x8x1xf32>
    %41 = vector.broadcast %40 : vector<4x2x8x1xf32> to vector<4x2x8x8xf32>
    %42 = arith.subf %38, %41 : vector<4x2x8x8xf32>
    %43 = math.exp %42 : vector<4x2x8x8xf32>
    %cst_25 = arith.constant dense<0.000000e+00> : vector<4x2x8xf32>
    %44 = vector.multi_reduction <add>, %43, %cst_25 [3] : vector<4x2x8x8xf32> to vector<4x2x8xf32>
    %45 = vector.shape_cast %44 : vector<4x2x8xf32> to vector<4x2x8x1xf32>
    %46 = tpu.reciprocal %45 {approx = true} : vector<4x2x8x1xf32> -> vector<4x2x8x1xf32>
    %47 = vector.broadcast %46 : vector<4x2x8x1xf32> to vector<4x2x8x8xf32>
    %48 = arith.mulf %43, %47 : vector<4x2x8x8xf32>
    %49 = vector.shape_cast %48 : vector<4x2x8x8xf32> to vector<8x8x8xf32>
    %50 = arith.truncf %49 : vector<8x8x8xf32> to vector<8x8x8xbf16>
    "tpu.trace_start"() <{level = 10 : i32, message = "gij,gjd->gid"}> : () -> ()
    %cst_26 = arith.constant dense<0.000000e+00> : vector<8x8x8xf32>
    %51 = tpu.matmul %50, %32, %cst_26 {dimension_numbers = #tpu.dot_dimension_numbers<[2], [1], [1], [2], [0, 0, 0, 1, 1, 2], [0], [0]>} : vector<8x8x8xbf16>, vector<8x8x8xbf16>, vector<8x8x8xf32> -> vector<8x8x8xf32>
    "tpu.trace_stop"() : () -> ()
    %c0_27 = arith.constant 0 : index
    %c0_28 = arith.constant 0 : index
    %c0_29 = arith.constant 0 : index
    %52 = vector.load %arg6[%c0_27, %c0_28, %c0_29] : memref<4x8x32xbf16, #tpu.memory_space<vmem>>, vector<4x8x32xbf16>
    %53 = vector.shape_cast %52 : vector<4x8x32xbf16> to vector<4x1x8x32xbf16>
    %54 = vector.shape_cast %53 : vector<4x1x8x32xbf16> to vector<4x1x8x32xbf16>
    %55 = vector.broadcast %54 : vector<4x1x8x32xbf16> to vector<4x2x8x32xbf16>
    %56 = vector.shape_cast %55 : vector<4x2x8x32xbf16> to vector<8x8x32xbf16>
    %57 = arith.truncf %51 : vector<8x8x8xf32> to vector<8x8x8xbf16>
    "tpu.trace_start"() <{level = 10 : i32, message = "gid,gdm->gim"}> : () -> ()
    %cst_30 = arith.constant dense<0.000000e+00> : vector<8x8x32xf32>
    %58 = tpu.matmul %57, %56, %cst_30 {dimension_numbers = #tpu.dot_dimension_numbers<[2], [1], [1], [2], [0, 0, 0, 1, 1, 2], [0], [0]>} : vector<8x8x8xbf16>, vector<8x8x32xbf16>, vector<8x8x32xf32> -> vector<8x8x32xf32>
    "tpu.trace_stop"() : () -> ()
    %59 = vector.shape_cast %58 : vector<8x8x32xf32> to vector<4x2x8x32xf32>
    %cst_31 = arith.constant dense<0.000000e+00> : vector<2x8x32xf32>
    %60 = vector.multi_reduction <add>, %59, %cst_31 [0] : vector<4x2x8x32xf32> to vector<2x8x32xf32>
    %61 = vector.shape_cast %60 : vector<2x8x32xf32> to vector<16x32xf32>
    %c0_32 = arith.constant 0 : index
    %c0_33 = arith.constant 0 : index
    %62 = vector.load %arg10[%c0_32, %c0_33] : memref<8x32xf32, #tpu.memory_space<vmem>>, vector<8x32xf32>
    %63 = vector.extract_strided_slice %62 {offsets = [0, 0], sizes = [1, 32], strides = [1, 1]} : vector<8x32xf32> to vector<1x32xf32>
    %64 = vector.extract_strided_slice %62 {offsets = [1, 0], sizes = [1, 32], strides = [1, 1]} : vector<8x32xf32> to vector<1x32xf32>
    %65 = vector.extract_strided_slice %62 {offsets = [2, 0], sizes = [1, 32], strides = [1, 1]} : vector<8x32xf32> to vector<1x32xf32>
    %66 = vector.extract_strided_slice %62 {offsets = [3, 0], sizes = [1, 32], strides = [1, 1]} : vector<8x32xf32> to vector<1x32xf32>
    %67 = vector.extract_strided_slice %62 {offsets = [4, 0], sizes = [1, 32], strides = [1, 1]} : vector<8x32xf32> to vector<1x32xf32>
    %68 = vector.extract_strided_slice %62 {offsets = [5, 0], sizes = [1, 32], strides = [1, 1]} : vector<8x32xf32> to vector<1x32xf32>
    %69 = vector.broadcast %63 : vector<1x32xf32> to vector<16x32xf32>
    %70 = arith.addf %61, %69 : vector<16x32xf32>
    %71 = arith.addf %70, %1 : vector<16x32xf32>
    %cst_34 = arith.constant dense<0.000000e+00> : vector<16xf32>
    %72 = vector.multi_reduction <add>, %71, %cst_34 [1] : vector<16x32xf32> to vector<16xf32>
    %73 = vector.shape_cast %72 : vector<16xf32> to vector<16x1xf32>
    %cst_35 = arith.constant 3.200000e+01 : f32
    %74 = vector.broadcast %cst_35 : f32 to vector<16x1xf32>
    %75 = arith.divf %73, %74 : vector<16x1xf32>
    %76 = vector.broadcast %75 : vector<16x1xf32> to vector<16x32xf32>
    %77 = arith.subf %71, %76 : vector<16x32xf32>
    %78 = arith.mulf %77, %77 : vector<16x32xf32>
    %cst_36 = arith.constant dense<0.000000e+00> : vector<16xf32>
    %79 = vector.multi_reduction <add>, %78, %cst_36 [1] : vector<16x32xf32> to vector<16xf32>
    %80 = vector.shape_cast %79 : vector<16xf32> to vector<16x1xf32>
    %cst_37 = arith.constant 3.200000e+01 : f32
    %81 = vector.broadcast %cst_37 : f32 to vector<16x1xf32>
    %82 = arith.divf %80, %81 : vector<16x1xf32>
    %cst_38 = arith.constant 9.99999974E-6 : f32
    %83 = vector.broadcast %cst_38 : f32 to vector<16x1xf32>
    %84 = arith.addf %82, %83 : vector<16x1xf32>
    %85 = math.rsqrt %84 : vector<16x1xf32>
    %86 = vector.broadcast %85 : vector<16x1xf32> to vector<16x32xf32>
    %87 = arith.mulf %77, %86 : vector<16x32xf32>
    %88 = vector.broadcast %64 : vector<1x32xf32> to vector<16x32xf32>
    %89 = arith.mulf %87, %88 : vector<16x32xf32>
    %90 = vector.broadcast %65 : vector<1x32xf32> to vector<16x32xf32>
    %91 = arith.addf %89, %90 : vector<16x32xf32>
    %92 = arith.truncf %91 : vector<16x32xf32> to vector<16x32xbf16>
    %c0_39 = arith.constant 0 : index
    %c0_40 = arith.constant 0 : index
    %93 = vector.load %arg7[%c0_39, %c0_40] : memref<32x64xbf16, #tpu.memory_space<vmem>>, vector<32x64xbf16>
    "tpu.trace_start"() <{level = 10 : i32, message = "rd,df->rf"}> : () -> ()
    %cst_41 = arith.constant dense<0.000000e+00> : vector<16x64xf32>
    %94 = tpu.matmul %92, %93, %cst_41 {dimension_numbers = #tpu.dot_dimension_numbers<[1], [0], [0], [1], [0, 0, 1, 1], [], []>} : vector<16x32xbf16>, vector<32x64xbf16>, vector<16x64xf32> -> vector<16x64xf32>
    "tpu.trace_stop"() : () -> ()
    %c0_42 = arith.constant 0 : index
    %c0_43 = arith.constant 0 : index
    %95 = vector.load %arg8[%c0_42, %c0_43] : memref<1x64xf32, #tpu.memory_space<vmem>>, vector<1x64xf32>
    %96 = vector.broadcast %95 : vector<1x64xf32> to vector<16x64xf32>
    %97 = arith.addf %94, %96 : vector<16x64xf32>
    %cst_44 = arith.constant 0.000000e+00 : f32
    %98 = vector.broadcast %cst_44 : f32 to vector<16x64xf32>
    %99 = arith.maximumf %97, %98 : vector<16x64xf32>
    %100 = arith.truncf %99 : vector<16x64xf32> to vector<16x64xbf16>
    %c0_45 = arith.constant 0 : index
    %c0_46 = arith.constant 0 : index
    %101 = vector.load %arg9[%c0_45, %c0_46] : memref<64x32xbf16, #tpu.memory_space<vmem>>, vector<64x32xbf16>
    "tpu.trace_start"() <{level = 10 : i32, message = "rf,fd->rd"}> : () -> ()
    %cst_47 = arith.constant dense<0.000000e+00> : vector<16x32xf32>
    %102 = tpu.matmul %100, %101, %cst_47 {dimension_numbers = #tpu.dot_dimension_numbers<[1], [0], [0], [1], [0, 0, 1, 1], [], []>} : vector<16x64xbf16>, vector<64x32xbf16>, vector<16x32xf32> -> vector<16x32xf32>
    "tpu.trace_stop"() : () -> ()
    %103 = arith.addf %91, %102 : vector<16x32xf32>
    %104 = vector.broadcast %68 : vector<1x32xf32> to vector<16x32xf32>
    %105 = arith.addf %103, %104 : vector<16x32xf32>
    %cst_48 = arith.constant dense<0.000000e+00> : vector<16xf32>
    %106 = vector.multi_reduction <add>, %105, %cst_48 [1] : vector<16x32xf32> to vector<16xf32>
    %107 = vector.shape_cast %106 : vector<16xf32> to vector<16x1xf32>
    %cst_49 = arith.constant 3.200000e+01 : f32
    %108 = vector.broadcast %cst_49 : f32 to vector<16x1xf32>
    %109 = arith.divf %107, %108 : vector<16x1xf32>
    %110 = vector.broadcast %109 : vector<16x1xf32> to vector<16x32xf32>
    %111 = arith.subf %105, %110 : vector<16x32xf32>
    %112 = arith.mulf %111, %111 : vector<16x32xf32>
    %cst_50 = arith.constant dense<0.000000e+00> : vector<16xf32>
    %113 = vector.multi_reduction <add>, %112, %cst_50 [1] : vector<16x32xf32> to vector<16xf32>
    %114 = vector.shape_cast %113 : vector<16xf32> to vector<16x1xf32>
    %cst_51 = arith.constant 3.200000e+01 : f32
    %115 = vector.broadcast %cst_51 : f32 to vector<16x1xf32>
    %116 = arith.divf %114, %115 : vector<16x1xf32>
    %cst_52 = arith.constant 9.99999974E-6 : f32
    %117 = vector.broadcast %cst_52 : f32 to vector<16x1xf32>
    %118 = arith.addf %116, %117 : vector<16x1xf32>
    %119 = math.rsqrt %118 : vector<16x1xf32>
    %120 = vector.broadcast %119 : vector<16x1xf32> to vector<16x32xf32>
    %121 = arith.mulf %111, %120 : vector<16x32xf32>
    %122 = vector.broadcast %66 : vector<1x32xf32> to vector<16x32xf32>
    %123 = arith.mulf %121, %122 : vector<16x32xf32>
    %124 = vector.broadcast %67 : vector<1x32xf32> to vector<16x32xf32>
    %125 = arith.addf %123, %124 : vector<16x32xf32>
    %126 = vector.shape_cast %125 : vector<16x32xf32> to vector<2x8x32xf32>
    %c0_53 = arith.constant 0 : index
    %c0_54 = arith.constant 0 : index
    %c0_55 = arith.constant 0 : index
    %127 = vector.load %arg11[%c0_53, %c0_54, %c0_55] : memref<2x8x32xf32, #tpu.memory_space<vmem>>, vector<2x8x32xf32>
    tpu.vector_store %arg11[%c0_53, %c0_54, %c0_55], %126 {strides = array<i32>} : memref<2x8x32xf32, #tpu.memory_space<vmem>>, vector<2x8x32xf32>,
    return
  }
  func.func @transform_0(%arg0: i32) -> (i32, i32, i32) {
    %c0_i32 = arith.constant 0 : i32
    %c0_i32_0 = arith.constant 0 : i32
    %c0_i32_1 = arith.constant 0 : i32
    return %arg0, %c0_i32, %c0_i32_0 : i32, i32, i32
  }
  func.func @transform_1(%arg0: i32) -> (i32, i32, i32) {
    %c0_i32 = arith.constant 0 : i32
    %c0_i32_0 = arith.constant 0 : i32
    %c0_i32_1 = arith.constant 0 : i32
    return %arg0, %c0_i32, %c0_i32_0 : i32, i32, i32
  }
  func.func @transform_2(%arg0: i32) -> (i32, i32, i32) {
    %c0_i32 = arith.constant 0 : i32
    %c0_i32_0 = arith.constant 0 : i32
    %c0_i32_1 = arith.constant 0 : i32
    return %arg0, %c0_i32, %c0_i32_0 : i32, i32, i32
  }
  func.func @transform_3(%arg0: i32) -> (i32, i32, i32, i32) {
    %c0_i32 = arith.constant 0 : i32
    %c0_i32_0 = arith.constant 0 : i32
    %c0_i32_1 = arith.constant 0 : i32
    %c0_i32_2 = arith.constant 0 : i32
    %c0_i32_3 = arith.constant 0 : i32
    return %c0_i32, %c0_i32_0, %c0_i32_1, %c0_i32_2 : i32, i32, i32, i32
  }
  func.func @transform_4(%arg0: i32) -> (i32, i32, i32) {
    %c0_i32 = arith.constant 0 : i32
    %c0_i32_0 = arith.constant 0 : i32
    %c0_i32_1 = arith.constant 0 : i32
    %c0_i32_2 = arith.constant 0 : i32
    return %c0_i32, %c0_i32_0, %c0_i32_1 : i32, i32, i32
  }
  func.func @transform_5(%arg0: i32) -> (i32, i32, i32) {
    %c0_i32 = arith.constant 0 : i32
    %c0_i32_0 = arith.constant 0 : i32
    %c0_i32_1 = arith.constant 0 : i32
    %c0_i32_2 = arith.constant 0 : i32
    return %c0_i32, %c0_i32_0, %c0_i32_1 : i32, i32, i32
  }
  func.func @transform_6(%arg0: i32) -> (i32, i32) {
    %c0_i32 = arith.constant 0 : i32
    %c0_i32_0 = arith.constant 0 : i32
    %c0_i32_1 = arith.constant 0 : i32
    return %c0_i32, %c0_i32_0 : i32, i32
  }
  func.func @transform_7(%arg0: i32) -> (i32, i32) {
    %c0_i32 = arith.constant 0 : i32
    %c0_i32_0 = arith.constant 0 : i32
    %c0_i32_1 = arith.constant 0 : i32
    return %c0_i32, %c0_i32_0 : i32, i32
  }
  func.func @transform_8(%arg0: i32) -> (i32, i32) {
    %c0_i32 = arith.constant 0 : i32
    %c0_i32_0 = arith.constant 0 : i32
    %c0_i32_1 = arith.constant 0 : i32
    return %c0_i32, %c0_i32_0 : i32, i32
  }
  func.func @transform_9(%arg0: i32) -> (i32, i32) {
    %c0_i32 = arith.constant 0 : i32
    %c0_i32_0 = arith.constant 0 : i32
    %c0_i32_1 = arith.constant 0 : i32
    return %c0_i32, %c0_i32_0 : i32, i32
  }
  func.func @transform_10(%arg0: i32) -> (i32, i32, i32) {
    %c0_i32 = arith.constant 0 : i32
    %c0_i32_0 = arith.constant 0 : i32
    %c0_i32_1 = arith.constant 0 : i32
    return %arg0, %c0_i32, %c0_i32_0 : i32, i32, i32
  }
}

</mosaic_0001>

<bundles_post_ra>
// kernel: tpu_custom_call.1
= control target key start
LH: loop header
LB: loop body
LE: loop exit
PB: predicated region body
PF: predicated region fallthrough
CT: control target
= control target key end

     0   :  { %vm116_vm0 = vcmask 261120   ;;  %s1881_s0 = inlined_call_operand.vmem [shape: f32[2,8,32], index: 0, kind: input, shape index: {}]   ;;  %s1882_s1 = inlined_call_operand.vmem [shape: f32[2,8,32], index: 1, kind: input, shape index: {}]   ;;  %s1883_s2 = inlined_call_operand.vmem [shape: f32[2,8,32], index: 2, kind: input, shape index: {}]   ;;  %s1884_s3 = inlined_call_operand.vmem [shape: bf16[3,4,32,8], index: 3, kind: input, shape index: {}]   ;;  %s1885_s4 = inlined_call_operand.vmem [shape: f32[4,8,8], index: 4, kind: input, shape index: {}]   ;;  %s1886_s5 = inlined_call_operand.vmem [shape: bf16[4,8,32], index: 5, kind: input, shape index: {}]   ;;  %s1887_s6 = inlined_call_operand.vmem [shape: bf16[32,64], index: 6, kind: input, shape index: {}]   ;;  %s1888_s7 = inlined_call_operand.vmem [shape: f32[1,64], index: 7, kind: input, shape index: {}]   ;;  %s1889_s8 = inlined_call_operand.vmem [shape: bf16[64,32], index: 8, kind: input, shape index: {}]   ;;  %s1890_s9 = inlined_call_operand.vmem [shape: f32[8,32], index: 9, kind: input, shape index: {}]   ;;  %s1891_s10 = inlined_call_operand.hbm [shape: f32[2,8,32], index: 10, kind: output, shape index: {}]  }
   0x1   :  { %v1460_v0 = vld [vmem:[%s1884_s3 + $0x8] sm:$0xff]  ;;  %v1462_v1 = vld [vmem:[%s1884_s3 + $0x18] sm:$0xff]  ;;  %v1459_v3 = vld [vmem:[%s1884_s3] sm:$0xff] }
   0x2   :  { %v1466_v2 = vld [vmem:[%s1884_s3 + $0x38] sm:$0xff]  ;;  %v1461_v4 = vld [vmem:[%s1884_s3 + $0x10] sm:$0xff]  ;;  %126 = vmatpush.bf16.msra.mxu0 %v1460_v0  ;;  %152 = vmatpush.bf16.msra.mxu1 %v1462_v1  ;;  %v1639_v5 = vld [vmem:[%s1881_s0] sm:$0xff] }
   0x3   :  { %v1644_v6 = vld [vmem:[%s1881_s0 + $0x8] sm:$0xff]  ;;  %204 = vmatpush.bf16.msra.mxu3 %v1466_v2  ;;  %v1465_v8 = vld [vmem:[%s1884_s3 + $0x30] sm:$0xff]  ;;  %v39_v9 = vpack.c.bf16 %v1639_v5, %v1639_v5  ;;  %v1463_v12 = vld [vmem:[%s1884_s3 + $0x20] sm:$0xff] }
   0x4   :  { %v1464_v7 = vld [vmem:[%s1884_s3 + $0x28] sm:$0xff]  ;;  %v40_v10 = vpack.c.bf16 %v1644_v6, %v1644_v6  ;;  %v1470_v13 = vld [vmem:[%s1884_s3 + $0x58] sm:$0xff] }
   0x5   :  { %v1468_v11 = vld [vmem:[%s1884_s3 + $0x48] sm:$0xff]  ;;  %178 = vmatpush.bf16.msra.mxu2 %v1464_v7  ;;  %v101_v14 = vunpack.c.l.b16 %v39_v9  ;;  %v1474_v18 = vld [vmem:[%s1884_s3 + $0x78] sm:$0xff] }
   0x6   :  { %v102_v15 = vunpack.c.l.b16 %v40_v10  ;;  %127 = vmatpush.bf16.msra.mxu0 %v1459_v3  ;;  %153 = vmatpush.bf16.msra.mxu1 %v1461_v4  ;;  %v1472_v16 = vld [vmem:[%s1884_s3 + $0x68] sm:$0xff] }
   0x7   :  { %205 = vmatpush.bf16.msra.mxu3 %v1465_v8 }
   0x8   :  { %v103_v17 = vpack.c.b16 %v102_v15, %v101_v14 }
   0xa   :  { %246 = vmatpush.bf16.msrb.mxu0 %v1468_v11 }
   0xb   :  { %15 = vsyncpa [#allocation3], 0  ;;  %179 = vmatpush.bf16.msra.mxu2 %v1463_v12  ;;  %272 = vmatpush.bf16.msrb.mxu1 %v1470_v13  ;;  %v1467_v19 = vld [vmem:[%s1884_s3 + $0x40] sm:$0xff]  ;;  %v1469_v20 = vld [vmem:[%s1884_s3 + $0x50] sm:$0xff]  ;;  %vm460_vm1 = vcmask 64512   ;;  %vm724_vm2 = vcmask 1043456  }
   0xc   :  { %1309 = vmatmul.msk.bf16.vlgmr.msra.gmra.mxu0 %vm116_vm0, %v103_v17  ;;  %1318 = vmatmul.msk.bf16.vlgmr.msra.gmra.mxu1 %vm116_vm0, %v103_v17  ;;  %v41_v21 = vld [vmem:[%s1882_s1] sm:$0xff]  ;;  %v42_v22 = vld [vmem:[%s1882_s1 + $0x8] sm:$0xff]  ;;  %v1473_v24 = vld [vmem:[%s1884_s3 + $0x70] sm:$0xff]  ;;  %vm1176_vm10 = vcmask 523264   ;;  %s1257_s0 = sshll.u32 %s1891_s10, 4  ;;  %s1564_s13 = smov 128   ;;  %s1258_s0 = int_to_ptr.hbm [resolvable:$true] %s1257_s0 }
   0xd   :  { %1336 = vmatmul.msk.bf16.vlgmr.msra.gmra.mxu3 %vm116_vm0, %v103_v17  ;;  %v1471_v23 = vld [vmem:[%s1884_s3 + $0x60] sm:$0xff]  ;;  %v43_v25 = vpack.c.bf16 %v41_v21, %v41_v21  ;;  %v44_v26 = vpack.c.bf16 %v42_v22, %v42_v22  ;;  %v1480_v30 = vld [vmem:[%s1884_s3 + $0xa8] sm:$0xff]  ;;  %v1482_v40 = vld [vmem:[%s1884_s3 + $0xb8] sm:$0xff] }
   0xe   :  { %1327 = vmatmul.msk.bf16.vlgmr.msra.gmra.mxu2 %vm116_vm0, %v103_v17  ;;  %324 = vmatpush.bf16.msrb.mxu3 %v1474_v18  ;;  %v45_v31 = vld [vmem:[%s1883_s2] sm:$0xff]  ;;  %v46_v32 = vld [vmem:[%s1883_s2 + $0x8] sm:$0xff]  ;;  %v1481_v42 = vld [vmem:[%s1884_s3 + $0xb0] sm:$0xff] }
   0xf   :  { %298 = vmatpush.bf16.msrb.mxu2 %v1472_v16  ;;  %247 = vmatpush.bf16.msrb.mxu0 %v1467_v19  ;;  %v222_v27 = vunpack.c.l.b16 %v43_v25  ;;  %v223_v28 = vunpack.c.l.b16 %v44_v26  ;;  %v47_v33 = vpack.c.bf16 %v45_v31, %v45_v31  ;;  %v48_v34 = vpack.c.bf16 %v46_v32, %v46_v32  ;;  %v1479_v35 = vld [vmem:[%s1884_s3 + $0xa0] sm:$0xff]  ;;  %v1476_v36 = vld [vmem:[%s1884_s3 + $0x88] sm:$0xff]  ;;  %v1478_v43 = vld [vmem:[%s1884_s3 + $0x98] sm:$0xff] }
  0x10   :  { %273 = vmatpush.bf16.msrb.mxu1 %v1469_v20  ;;  %v1475_v41 = vld [vmem:[%s1884_s3 + $0x80] sm:$0xff]  ;;  %v1477_v44 = vld [vmem:[%s1884_s3 + $0x90] sm:$0xff] }
  0x11   :  { %v224_v29 = vpack.c.b16 %v223_v28, %v222_v27  ;;  %v342_v37 = vunpack.c.l.b16 %v47_v33  ;;  %v343_v38 = vunpack.c.l.b16 %v48_v34 }
  0x12   :  { %325 = vmatpush.bf16.msrb.mxu3 %v1473_v24 }
  0x13   :  { %299 = vmatpush.bf16.msrb.mxu2 %v1471_v23  ;;  %366 = vmatpush.bf16.msra.mxu0 %v1476_v36  ;;  %v344_v39 = vpack.c.b16 %v343_v38, %v342_v37 }
  0x14   :  { %392 = vmatpush.bf16.msra.mxu1 %v1478_v43 }
  0x16   :  { %444 = vmatpush.bf16.msra.mxu3 %v1482_v40 }
  0x17   :  { %418 = vmatpush.bf16.msra.mxu2 %v1480_v30  ;;  %367 = vmatpush.bf16.msra.mxu0 %v1475_v41 }
  0x18   :  { %393 = vmatpush.bf16.msra.mxu1 %v1477_v44 }
  0x1a   :  { %445 = vmatpush.bf16.msra.mxu3 %v1481_v42 }
  0x1b   :  { %419 = vmatpush.bf16.msra.mxu2 %v1479_v35 }
  0x1c   :  { %1345 = vmatmul.msk.bf16.vlgmr.msrb.gmra.mxu0 %vm116_vm0, %v224_v29  ;;  %1354 = vmatmul.msk.bf16.vlgmr.msrb.gmra.mxu1 %vm116_vm0, %v224_v29 }
  0x1d   :  { %1372 = vmatmul.msk.bf16.vlgmr.msrb.gmra.mxu3 %vm116_vm0, %v224_v29 }
  0x1e   :  { %1363 = vmatmul.msk.bf16.vlgmr.msrb.gmra.mxu2 %vm116_vm0, %v224_v29 }
  0x2c   :  { %1381 = vmatmul.msk.bf16.vlgmr.msra.gmra.mxu0 %vm116_vm0, %v344_v39  ;;  %1390 = vmatmul.msk.bf16.vlgmr.msra.gmra.mxu1 %vm116_vm0, %v344_v39 }
  0x2d   :  { %1408 = vmatmul.msk.bf16.vlgmr.msra.gmra.mxu3 %vm116_vm0, %v344_v39 }
  0x2e   :  { %1399 = vmatmul.msk.bf16.vlgmr.msra.gmra.mxu2 %vm116_vm0, %v344_v39 }
  0x89   :  { %v129_v45 = vpop.f32.mrf.mxu0  ;;  %v155_v46 = vpop.f32.mrf.mxu1 }
  0x8a   :  { %v212_v63 = vpack.c.bf16 %v129_v45, %v129_v45  ;;  %v214_v0 = vpack.c.bf16 %v155_v46, %v155_v46 }
  0x90   :  { %v207_v47 = vpop.f32.mrf.mxu3 }
  0x91   :  { %v131_v48 = vpop.f32.mrf.mxu0  ;;  %v157_v49 = vpop.f32.mrf.mxu1  ;;  %v218_v19 = vpack.c.bf16 %v207_v47, %v207_v47  ;;  %v613_v47 = vld [vmem:[%s1885_s4] sm:$0xff] }
  0x92   :  { %v181_v50 = vpop.f32.mrf.mxu2  ;;  %v213_v13 = vpack.c.bf16 %v131_v48, %v131_v48  ;;  %v215_v14 = vpack.c.bf16 %v157_v49, %v157_v49 }
  0x93   :  { %v216_v20 = vpack.c.bf16 %v181_v50, %v181_v50 }
  0x98   :  { %v209_v51 = vpop.f32.mrf.mxu3 }
  0x99   :  { %v249_v52 = vpop.f32.mrf.mxu0  ;;  %v275_v53 = vpop.f32.mrf.mxu1  ;;  %v219_v21 = vpack.c.bf16 %v209_v51, %v209_v51  ;;  %v614_v51 = vld [vmem:[%s1885_s4 + $0x8] sm:$0xff] }
  0x9a   :  { %v332_v54 = vpack.c.bf16 %v249_v52, %v249_v52  ;;  %v334_v55 = vpack.c.bf16 %v275_v53, %v275_v53  ;;  %v183_v56 = vpop.f32.mrf.mxu2 }
  0x9b   :  { %v217_v22 = vpack.c.bf16 %v183_v56, %v183_v56 }
  0x9c   :  { %v465_v57 = vsel %vm460_vm1, %v332_v54, 0  ;;  %v503_v58 = vsel %vm460_vm1, %v334_v55, 0 }
  0x9d   :  { %474 = vmatpush.bf16.xpose.msrb.mxu0 %v465_v57  ;;  %512 = vmatpush.bf16.xpose.msrb.mxu2 %v503_v58 }
  0xa0   :  { %v327_v59 = vpop.f32.mrf.mxu3 }
  0xa1   :  { %v251_v60 = vpop.f32.mrf.mxu0  ;;  %v277_v61 = vpop.f32.mrf.mxu1  ;;  %v338_v62 = vpack.c.bf16 %v327_v59, %v327_v59 }
  0xa2   :  { %v333_v1 = vpack.c.bf16 %v251_v60, %v251_v60  ;;  %v335_v2 = vpack.c.bf16 %v277_v61, %v277_v61  ;;  %v301_v3 = vpop.f32.mrf.mxu2 }
  0xa3   :  { %v579_v4 = vsel %vm460_vm1, %v338_v62, 0  ;;  %v336_v7 = vpack.c.bf16 %v301_v3, %v301_v3 }
  0xa4   :  { %v484_v8 = vsel %vm460_vm1, %v333_v1, 0  ;;  %v522_v9 = vsel %vm460_vm1, %v335_v2, 0  ;;  %1409 = vmatmul.msk.bf16.vlgmr.msrb.gmra.mxu0 %vm460_vm1, %v212_v63  ;;  %1411 = vmatmul.msk.bf16.vlgmr.msrb.gmra.mxu2 %vm460_vm1, %v214_v0  ;;  %v615_v1 = vld [vmem:[%s1885_s4 + $0x10] sm:$0xff]  ;;  %v616_v2 = vld [vmem:[%s1885_s4 + $0x18] sm:$0xff]  ;;  %s1565_s4 = smov 8  }
  0xa5   :  { %493 = vmatpush.bf16.xpose.msrb.mxu1 %v484_v8  ;;  %531 = vmatpush.bf16.xpose.msrb.mxu3 %v522_v9  ;;  %v541_v10 = vsel %vm460_vm1, %v336_v7, 0 }
  0xa6   :  { %550 = vmatpush.bf16.xpose.msra.mxu0 %v541_v10  ;;  %588 = vmatpush.bf16.xpose.msra.mxu2 %v579_v4 }
  0xa8   :  { %v329_v11 = vpop.f32.mrf.mxu3 }
  0xa9   :  { %v339_v12 = vpack.c.bf16 %v329_v11, %v329_v11  ;;  %v369_v23 = vpop.f32.mrf.mxu0  ;;  %v395_v30 = vpop.f32.mrf.mxu1 }
  0xaa   :  { %v303_v15 = vpop.f32.mrf.mxu2  ;;  %v452_v24 = vpack.c.bf16 %v369_v23, %v369_v23  ;;  %v454_v32 = vpack.c.bf16 %v395_v30, %v395_v30 }
  0xab   :  { %v598_v16 = vsel %vm460_vm1, %v339_v12, 0  ;;  %v337_v17 = vpack.c.bf16 %v303_v15, %v303_v15 }
  0xac   :  { %1410 = vmatmul.msk.bf16.vlgmr.msrb.gmra.mxu1 %vm460_vm1, %v213_v13  ;;  %1412 = vmatmul.msk.bf16.vlgmr.msrb.gmra.mxu3 %vm460_vm1, %v215_v14  ;;  %v726_v27 = vsel %vm724_vm2, %v452_v24, 0  ;;  %v764_v38 = vsel %vm724_vm2, %v454_v32, 0 }
  0xad   :  { %607 = vmatpush.bf16.xpose.msra.mxu3 %v598_v16  ;;  %v560_v18 = vsel %vm460_vm1, %v337_v17, 0 }
  0xae   :  { %569 = vmatpush.bf16.xpose.msra.mxu1 %v560_v18  ;;  %735 = vmatpush.bf16.msrb.mxu0 %v726_v27 }
  0xaf   :  { %773 = vmatpush.bf16.msrb.mxu2 %v764_v38 }
  0xb0   :  { %v447_v34 = vpop.f32.mrf.mxu3 }
  0xb1   :  { %v371_v29 = vpop.f32.mrf.mxu0  ;;  %v458_v36 = vpack.c.bf16 %v447_v34, %v447_v34  ;;  %v397_v41 = vpop.f32.mrf.mxu1 }
  0xb2   :  { %v421_v25 = vpop.f32.mrf.mxu2  ;;  %v453_v31 = vpack.c.bf16 %v371_v29, %v371_v29  ;;  %v455_v42 = vpack.c.bf16 %v397_v41, %v397_v41 }
  0xb3   :  { %v456_v26 = vpack.c.bf16 %v421_v25, %v421_v25  ;;  %v840_v40 = vsel %vm724_vm2, %v458_v36, 0 }
  0xb4   :  { %1413 = vmatmul.msk.bf16.vlgmr.msra.gmra.mxu0 %vm460_vm1, %v216_v20  ;;  %1415 = vmatmul.msk.bf16.vlgmr.msra.gmra.mxu2 %vm460_vm1, %v218_v19  ;;  %v745_v37 = vsel %vm724_vm2, %v453_v31, 0  ;;  %v783_v45 = vsel %vm724_vm2, %v455_v42, 0 }
  0xb5   :  { %v802_v28 = vsel %vm724_vm2, %v456_v26, 0  ;;  %849 = vmatpush.bf16.msra.mxu2 %v840_v40  ;;  %792 = vmatpush.bf16.msrb.mxu3 %v783_v45 }
  0xb6   :  { %811 = vmatpush.bf16.msra.mxu0 %v802_v28  ;;  %754 = vmatpush.bf16.msrb.mxu1 %v745_v37 }
  0xb8   :  { %v449_v43 = vpop.f32.mrf.mxu3 }
  0xb9   :  { %v459_v44 = vpack.c.bf16 %v449_v43, %v449_v43 }
  0xba   :  { %v423_v33 = vpop.f32.mrf.mxu2 }
  0xbb   :  { %v457_v35 = vpack.c.bf16 %v423_v33, %v423_v33  ;;  %v859_v46 = vsel %vm724_vm2, %v459_v44, 0 }
  0xbc   :  { %1414 = vmatmul.msk.bf16.vlgmr.msra.gmra.mxu1 %vm460_vm1, %v217_v22  ;;  %1416 = vmatmul.msk.bf16.vlgmr.msra.gmra.mxu3 %vm460_vm1, %v219_v21 }
  0xbd   :  { %v821_v39 = vsel %vm724_vm2, %v457_v35, 0  ;;  %868 = vmatpush.bf16.msra.mxu3 %v859_v46 }
  0xbe   :  { %830 = vmatpush.bf16.msra.mxu1 %v821_v39 }
 0x121   :  { %v476_v48 = vpop.f32.mrf.mxu0 }
 0x122   :  { %v617_v49 = vadd.f32 %v613_v47, %v476_v48 }
 0x124   :  { %v625_v50 = vsel %vm460_vm1, %v617_v49, -inf }
 0x125   :  { %626 = vmax.xlane.f32.xlu1 %v625_v50 }
 0x127   :  { %v514_v52 = vpop.f32.mrf.mxu2 }
 0x128   :  { %v619_v53 = vadd.f32 %v614_v51, %v514_v52 }
 0x129   :  { %v478_v54 = vpop.f32.mrf.mxu0  ;;  %v495_v55 = vpop.f32.mrf.mxu1 }
 0x12a   :  { %v618_v56 = vadd.f32 %v613_v47, %v495_v55  ;;  %v631_v57 = vsel %vm460_vm1, %v619_v53, -inf }
 0x12b   :  { %632 = vmax.xlane.f32.xlu0 %v631_v57 }
 0x12c   :  { %v628_v58 = vsel %vm460_vm1, %v618_v56, -inf }
 0x12d   :  { %629 = vmax.xlane.f32.xlu1 %v628_v58 }
 0x12f   :  { %v516_v59 = vpop.f32.mrf.mxu2  ;;  %v533_v60 = vpop.f32.mrf.mxu3 }
 0x130   :  { %v620_v61 = vadd.f32 %v614_v51, %v533_v60 }
 0x131   :  { %v497_v62 = vpop.f32.mrf.mxu1  ;;  %v552_v63 = vpop.f32.mrf.mxu0 }
 0x132   :  { %v634_v0 = vsel %vm460_vm1, %v620_v61, -inf  ;;  %v621_v3 = vadd.f32 %v615_v1, %v552_v63 }
 0x133   :  { %635 = vmax.xlane.f32.xlu0 %v634_v0 }
 0x134   :  { %v637_v13 = vsel %vm460_vm1, %v621_v3, -inf }
 0x137   :  { %v535_v4 = vpop.f32.mrf.mxu3  ;;  %v590_v7 = vpop.f32.mrf.mxu2 }
 0x138   :  { %v623_v8 = vadd.f32 %v616_v2, %v590_v7 }
 0x139   :  { %v554_v9 = vpop.f32.mrf.mxu0  ;;  %v571_v10 = vpop.f32.mrf.mxu1 }
 0x13a   :  { %v622_v11 = vadd.f32 %v615_v1, %v571_v10  ;;  %v643_v12 = vsel %vm460_vm1, %v623_v8, -inf }
 0x13b   :  { %644 = vmax.xlane.f32.xlu2 %v643_v12  ;;  %638 = vmax.xlane.f32.xlu0 %v637_v13 }
 0x13c   :  { %v640_v14 = vsel %vm460_vm1, %v622_v11, -inf }
 0x13d   :  { %641 = vmax.xlane.f32.xlu1 %v640_v14 }
 0x13f   :  { %v592_v15 = vpop.f32.mrf.mxu2  ;;  %v609_v16 = vpop.f32.mrf.mxu3 }
 0x140   :  { %v624_v17 = vadd.f32 %v616_v2, %v609_v16 }
 0x141   :  { %v573_v18 = vpop.f32.mrf.mxu1 }
 0x142   :  { %v646_v19 = vsel %vm460_vm1, %v624_v17, -inf }
 0x143   :  { %647 = vmax.xlane.f32.xlu2 %v646_v19 }
 0x147   :  { %v611_v20 = vpop.f32.mrf.mxu3 }
 0x198   :  { %v627_v21 = vpop.xlane.xlu1 %626 }
 0x199   :  { %v649_v22 = vsub.f32 %v617_v49, %v627_v21 }
 0x19b   :  { %v657_v23 = vmul.f32 1.442695, %v649_v22 }
 0x19d   :  { %1494 = vpow2.f32 %v657_v23 }
 0x19e   :  { %v633_v24 = vpop.xlane.xlu0 %632 }
 0x19f   :  { %v651_v25 = vsub.f32 %v619_v53, %v633_v24 }
 0x1a0   :  { %v630_v26 = vpop.xlane.xlu1 %629 }
 0x1a1   :  { %v661_v27 = vmul.f32 1.442695, %v651_v25  ;;  %v650_v28 = vsub.f32 %v618_v56, %v630_v26 }
 0x1a3   :  { %v1495_v29 = vpop.eup %1494  ;;  %1496 = vpow2.f32 %v661_v27  ;;  %v659_v31 = vmul.f32 1.442695, %v650_v28 }
 0x1a4   :  { %v673_v30 = vsel %vm460_vm1, %v1495_v29, 0.0 }
 0x1a5   :  { %674 = vadd.xlane.f32.xlu1 %v673_v30  ;;  %1498 = vpow2.f32 %v659_v31  ;;  %v874_v31 = vld [vmem:[%s1886_s5] sm:$0xf] }
 0x1a6   :  { %v636_v32 = vpop.xlane.xlu0 %635 }
 0x1a7   :  { %v652_v33 = vsub.f32 %v620_v61, %v636_v32  ;;  %v890_v32 = vsel %vm724_vm2, %v874_v31, 0 }
 0x1a9   :  { %v1497_v34 = vpop.eup %1496  ;;  %v663_v35 = vmul.f32 1.442695, %v652_v33  ;;  %v875_v33 = vld [vmem:[%s1886_s5 + $0x4] sm:$0xf] }
 0x1aa   :  { %v679_v36 = vsel %vm460_vm1, %v1497_v34, 0.0 }
 0x1ab   :  { %1500 = vpow2.f32 %v663_v35  ;;  %680 = vadd.xlane.f32.xlu2 %v679_v36  ;;  %v1499_v39 = vpop.eup %1498  ;;  %v876_v35 = vld [vmem:[%s1886_s5 + $0x8] sm:$0xf] }
 0x1ac   :  { %v676_v48 = vsel %vm460_vm1, %v1499_v39, 0.0  ;;  %v960_v36 = vsel %vm724_vm2, %v876_v35, 0 }
 0x1ae   :  { %v645_v37 = vpop.xlane.xlu2 %644  ;;  %v639_v38 = vpop.xlane.xlu0 %638 }
 0x1af   :  { %v655_v40 = vsub.f32 %v623_v8, %v645_v37  ;;  %v653_v41 = vsub.f32 %v621_v3, %v639_v38  ;;  %v877_v37 = vld [vmem:[%s1886_s5 + $0xc] sm:$0xf] }
 0x1b0   :  { %v642_v42 = vpop.xlane.xlu1 %641  ;;  %v995_v38 = vsel %vm724_vm2, %v877_v37, 0 }
 0x1b1   :  { %v1501_v43 = vpop.eup %1500  ;;  %v669_v44 = vmul.f32 1.442695, %v655_v40  ;;  %v665_v45 = vmul.f32 1.442695, %v653_v41  ;;  %v654_v46 = vsub.f32 %v622_v11, %v642_v42 }
 0x1b2   :  { %v682_v47 = vsel %vm460_vm1, %v1501_v43, 0.0 }
 0x1b3   :  { %1502 = vpow2.f32 %v669_v44  ;;  %683 = vadd.xlane.f32.xlu0 %v682_v47  ;;  %677 = vadd.xlane.f32.xlu2 %v676_v48  ;;  %v667_v49 = vmul.f32 1.442695, %v654_v46 }
 0x1b4   :  { %1504 = vpow2.f32 %v665_v45 }
 0x1b5   :  { %1506 = vpow2.f32 %v667_v49 }
 0x1b6   :  { %v648_v50 = vpop.xlane.xlu2 %647 }
 0x1b7   :  { %v656_v51 = vsub.f32 %v624_v17, %v648_v50 }
 0x1b9   :  { %v1503_v52 = vpop.eup %1502  ;;  %v671_v53 = vmul.f32 1.442695, %v656_v51 }
 0x1ba   :  { %v1505_v54 = vpop.eup %1504  ;;  %v691_v55 = vsel %vm460_vm1, %v1503_v52, 0.0 }
 0x1bb   :  { %1508 = vpow2.f32 %v671_v53  ;;  %692 = vadd.xlane.f32.xlu0 %v691_v55  ;;  %v685_v56 = vsel %vm460_vm1, %v1505_v54, 0.0  ;;  %v1507_v57 = vpop.eup %1506 }
 0x1bc   :  { %686 = vadd.xlane.f32.xlu2 %v685_v56  ;;  %v688_v60 = vsel %vm460_vm1, %v1507_v57, 0.0 }
 0x1c1   :  { %v1509_v58 = vpop.eup %1508 }
 0x1c2   :  { %v694_v59 = vsel %vm460_vm1, %v1509_v58, 0.0 }
 0x1c3   :  { %695 = vadd.xlane.f32.xlu1 %v694_v59  ;;  %689 = vadd.xlane.f32.xlu0 %v688_v60 }
 0x218   :  { %v675_v61 = vpop.xlane.xlu1 %674 }
 0x219   :  { %1510 = vrcp.f32 %v675_v61 }
 0x21e   :  { %v681_v62 = vpop.xlane.xlu2 %680 }
 0x21f   :  { %v1511_v63 = vpop.eup %1510  ;;  %1512 = vrcp.f32 %v681_v62 }
 0x220   :  { %v705_v0 = vmul.f32 %v1511_v63, %v1495_v29 }
 0x222   :  { %v713_v1 = vpack.c.bf16 %v705_v0, %v705_v0 }
 0x224   :  { %1417 = vmatmul.msk.bf16.vlgmr.msrb.gmra.mxu0 %vm460_vm1, %v713_v1 }
 0x225   :  { %v1513_v2 = vpop.eup %1512  ;;  %899 = vmatpush.bf16.msrb.mxu0 %v890_v32 }
 0x226   :  { %v707_v3 = vmul.f32 %v1513_v2, %v1497_v34  ;;  %v684_v4 = vpop.xlane.xlu0 %683  ;;  %v678_v7 = vpop.xlane.xlu2 %677  ;;  %v925_v34 = vsel %vm724_vm2, %v875_v33, 0 }
 0x227   :  { %1514 = vrcp.f32 %v684_v4 }
 0x228   :  { %v715_v8 = vpack.c.bf16 %v707_v3, %v707_v3  ;;  %1516 = vrcp.f32 %v678_v7 }
 0x22a   :  { %1419 = vmatmul.msk.bf16.vlgmr.msrb.gmra.mxu2 %vm460_vm1, %v715_v8 }
 0x22b   :  { %934 = vmatpush.bf16.msrb.mxu2 %v925_v34 }
 0x22d   :  { %v1515_v9 = vpop.eup %1514 }
 0x22e   :  { %v1517_v10 = vpop.eup %1516  ;;  %v708_v11 = vmul.f32 %v1515_v9, %v1501_v43  ;;  %v693_v12 = vpop.xlane.xlu0 %692 }
 0x22f   :  { %v706_v13 = vmul.f32 %v1517_v10, %v1499_v39  ;;  %1518 = vrcp.f32 %v693_v12  ;;  %v687_v14 = vpop.xlane.xlu2 %686 }
 0x230   :  { %v716_v15 = vpack.c.bf16 %v708_v11, %v708_v11  ;;  %1520 = vrcp.f32 %v687_v14  ;;  %v1821_v14 = vld [vmem:[%s1890_s9] sm:$0xff] }
 0x231   :  { %v714_v16 = vpack.c.bf16 %v706_v13, %v706_v13 }
 0x232   :  { %1420 = vmatmul.msk.bf16.vlgmr.msrb.gmra.mxu3 %vm460_vm1, %v716_v15 }
 0x233   :  { %1418 = vmatmul.msk.bf16.vlgmr.msrb.gmra.mxu1 %vm460_vm1, %v714_v16  ;;  %950 = vmatpush.bf16.msrb.mxu3 %v925_v34 }
 0x234   :  { %915 = vmatpush.bf16.msrb.mxu1 %v890_v32 }
 0x235   :  { %v1519_v17 = vpop.eup %1518 }
 0x236   :  { %v1521_v18 = vpop.eup %1520  ;;  %v711_v19 = vmul.f32 %v1519_v17, %v1503_v52  ;;  %v690_v20 = vpop.xlane.xlu0 %689 }
 0x237   :  { %v696_v21 = vpop.xlane.xlu1 %695  ;;  %v709_v22 = vmul.f32 %v1521_v18, %v1505_v54  ;;  %1522 = vrcp.f32 %v690_v20 }
 0x238   :  { %v719_v23 = vpack.c.bf16 %v711_v19, %v711_v19  ;;  %1524 = vrcp.f32 %v696_v21  ;;  %v1041_v19 = vperm.slane %v1821_v14, 0 }
 0x239   :  { %v717_v24 = vpack.c.bf16 %v709_v22, %v709_v22 }
 0x23a   :  { %1423 = vmatmul.msk.bf16.vlgmr.msra.gmra.mxu2 %vm460_vm1, %v719_v23 }
 0x23b   :  { %1421 = vmatmul.msk.bf16.vlgmr.msra.gmra.mxu0 %vm460_vm1, %v717_v24  ;;  %1004 = vmatpush.bf16.msra.mxu2 %v995_v38 }
 0x23c   :  { %969 = vmatpush.bf16.msra.mxu0 %v960_v36 }
 0x23d   :  { %v1523_v25 = vpop.eup %1522 }
 0x23e   :  { %v1525_v26 = vpop.eup %1524  ;;  %v710_v27 = vmul.f32 %v1523_v25, %v1507_v57 }
 0x23f   :  { %v712_v28 = vmul.f32 %v1525_v26, %v1509_v58 }
 0x240   :  { %v718_v29 = vpack.c.bf16 %v710_v27, %v710_v27 }
 0x241   :  { %v720_v30 = vpack.c.bf16 %v712_v28, %v712_v28 }
 0x243   :  { %1422 = vmatmul.msk.bf16.vlgmr.msra.gmra.mxu1 %vm460_vm1, %v718_v29  ;;  %1424 = vmatmul.msk.bf16.vlgmr.msra.gmra.mxu3 %vm460_vm1, %v720_v30 }
 0x244   :  { %985 = vmatpush.bf16.msra.mxu1 %v960_v36  ;;  %1020 = vmatpush.bf16.msra.mxu3 %v995_v38 }
 0x2a1   :  { %v737_v39 = vpop.f32.mrf.mxu0 }
 0x2a2   :  { %v878_v40 = vpack.c.bf16 %v737_v39, %v737_v39  ;;  %v1562_v39 = vmov 32.0  }
 0x2a3   :  { %1526 = vrcp.f32 %v1562_v39 }
 0x2a4   :  { %1425 = vmatmul.msk.bf16.vlgmr.msrb.gmra.mxu0 %vm460_vm1, %v878_v40 }
 0x2a9   :  { %v739_v41 = vpop.f32.mrf.mxu0 }
 0x2ad   :  { %v775_v42 = vpop.f32.mrf.mxu2 }
 0x2ae   :  { %v880_v43 = vpack.c.bf16 %v775_v42, %v775_v42 }
 0x2b0   :  { %v756_v44 = vpop.f32.mrf.mxu1  ;;  %1427 = vmatmul.msk.bf16.vlgmr.msrb.gmra.mxu2 %vm460_vm1, %v880_v43 }
 0x2b1   :  { %v879_v45 = vpack.c.bf16 %v756_v44, %v756_v44 }
 0x2b3   :  { %1426 = vmatmul.msk.bf16.vlgmr.msrb.gmra.mxu1 %vm460_vm1, %v879_v45 }
 0x2b5   :  { %v777_v46 = vpop.f32.mrf.mxu2  ;;  %v794_v47 = vpop.f32.mrf.mxu3 }
 0x2b6   :  { %v881_v48 = vpack.c.bf16 %v794_v47, %v794_v47 }
 0x2b8   :  { %v758_v49 = vpop.f32.mrf.mxu1  ;;  %v813_v50 = vpop.f32.mrf.mxu0  ;;  %1428 = vmatmul.msk.bf16.vlgmr.msrb.gmra.mxu3 %vm460_vm1, %v881_v48 }
 0x2b9   :  { %v882_v51 = vpack.c.bf16 %v813_v50, %v813_v50 }
 0x2bb   :  { %1429 = vmatmul.msk.bf16.vlgmr.msra.gmra.mxu0 %vm460_vm1, %v882_v51 }
 0x2bd   :  { %v796_v52 = vpop.f32.mrf.mxu3  ;;  %v851_v53 = vpop.f32.mrf.mxu2 }
 0x2be   :  { %v884_v54 = vpack.c.bf16 %v851_v53, %v851_v53 }
 0x2c0   :  { %v815_v55 = vpop.f32.mrf.mxu0  ;;  %v832_v56 = vpop.f32.mrf.mxu1  ;;  %1431 = vmatmul.msk.bf16.vlgmr.msra.gmra.mxu2 %vm460_vm1, %v884_v54  ;;  %v1484_v54 = vld [vmem:[%s1887_s6 + $0x8] sm:$0xff] }
 0x2c1   :  { %v883_v57 = vpack.c.bf16 %v832_v56, %v832_v56  ;;  %1133 = vmatpush.bf16.msrb.mxu0 %v1484_v54 }
 0x2c3   :  { %1430 = vmatmul.msk.bf16.vlgmr.msra.gmra.mxu1 %vm460_vm1, %v883_v57 }
 0x2c5   :  { %v853_v58 = vpop.f32.mrf.mxu2 }
 0x2c6   :  { %v870_v59 = vpop.f32.mrf.mxu3  ;;  %v1483_v58 = vld [vmem:[%s1887_s6] sm:$0xff] }
 0x2c7   :  { %v885_v60 = vpack.c.bf16 %v870_v59, %v870_v59  ;;  %1134 = vmatpush.bf16.msrb.mxu0 %v1483_v58 }
 0x2c8   :  { %v834_v61 = vpop.f32.mrf.mxu1 }
 0x2c9   :  { %1432 = vmatmul.msk.bf16.vlgmr.msra.gmra.mxu3 %vm460_vm1, %v885_v60 }
 0x2ce   :  { %v872_v62 = vpop.f32.mrf.mxu3 }
 0x321   :  { %v901_v63 = vpop.f32.mrf.mxu0 }
 0x322   :  { %v1026_v10 = vsel %vm116_vm0, %v901_v63, 0.0 }
 0x329   :  { %v903_v0 = vpop.f32.mrf.mxu0 }
 0x330   :  { %v917_v1 = vpop.f32.mrf.mxu1 }
 0x331   :  { %v1033_v25 = vsel %vm116_vm0, %v917_v1, 0.0 }
 0x333   :  { %v936_v2 = vpop.f32.mrf.mxu2 }
 0x334   :  { %v1027_v9 = vsel %vm116_vm0, %v936_v2, 0.0 }
 0x335   :  { %v1028_v15 = vadd.f32 %v1027_v9, %v1026_v10 }
 0x338   :  { %v919_v3 = vpop.f32.mrf.mxu1  ;;  %v971_v4 = vpop.f32.mrf.mxu0 }
 0x339   :  { %v1029_v11 = vsel %vm116_vm0, %v971_v4, 0.0 }
 0x33a   :  { %v1030_v16 = vadd.f32 %v1029_v11, %v1028_v15 }
 0x33b   :  { %v938_v7 = vpop.f32.mrf.mxu2  ;;  %v952_v8 = vpop.f32.mrf.mxu3 }
 0x33c   :  { %v1034_v22 = vsel %vm116_vm0, %v952_v8, 0.0 }
 0x33d   :  { %v1035_v28 = vadd.f32 %v1034_v22, %v1033_v25  ;;  %v1487_v25 = vld [vmem:[%s1889_s8 + $0x10] sm:$0xff] }
 0x340   :  { %v973_v12 = vpop.f32.mrf.mxu0  ;;  %v987_v13 = vpop.f32.mrf.mxu1 }
 0x341   :  { %v1036_v26 = vsel %vm116_vm0, %v987_v13, 0.0  ;;  %v1097_v12 = vperm.slane %v1821_v14, 1 }
 0x342   :  { %v1037_v31 = vadd.f32 %v1036_v26, %v1035_v28  ;;  %v1486_v26 = vld [vmem:[%s1889_s8 + $0x8] sm:$0xff] }
 0x343   :  { %v954_v17 = vpop.f32.mrf.mxu3  ;;  %v1006_v18 = vpop.f32.mrf.mxu2 }
 0x344   :  { %v1031_v20 = vsel %vm116_vm0, %v1006_v18, 0.0  ;;  %v1100_v17 = vperm.slane %v1821_v14, 2 }
 0x345   :  { %v1032_v21 = vadd.f32 %v1031_v20, %v1030_v16 }
 0x347   :  { %v1042_v23 = vadd.f32 %v1041_v19, %v1032_v21 }
 0x348   :  { %v989_v24 = vpop.f32.mrf.mxu1 }
 0x349   :  { %v1044_v27 = vadd.f32 %v1042_v23, %v1639_v5  ;;  %v1527_v5 = vpop.eup %1526  ;;  %v1488_v24 = vld [vmem:[%s1889_s8 + $0x18] sm:$0xff] }
 0x34a   :  { %v1053_v40 = vmul.f32 32.0, %v1527_v5  ;;  %vm1057_vm3 = vweird.f32 %v1527_v5  ;;  %1184 = vmatpush.bf16.msrb.mxu1 %v1488_v24 }
 0x34b   :  { %v1008_v29 = vpop.f32.mrf.mxu2  ;;  %v1046_v30 = vsel %vm116_vm0, %v1044_v27, 0.0 }
 0x34c   :  { %v1022_v32 = vpop.f32.mrf.mxu3  ;;  %1047 = vadd.xlane.f32.xlu1 %v1046_v30  ;;  %v1054_v41 = vsub.f32 1.0, %v1053_v40  ;;  %v1493_v29 = vld [vmem:[%s1888_s7] ss:$0 sm:$0xff]  ;;  %s1563_s7 = smov [#allocation2]  }
 0x34d   :  { %v1038_v33 = vsel %vm116_vm0, %v1022_v32, 0.0 }
 0x34e   :  { %v1039_v34 = vadd.f32 %v1038_v33, %v1037_v31  ;;  %v1055_v42 = vmul.f32 %v1527_v5, %v1054_v41  ;;  %1185 = vmatpush.bf16.msrb.mxu1 %v1487_v25 }
 0x350   :  { %v1043_v35 = vadd.f32 %v1041_v19, %v1039_v34  ;;  %v1056_v43 = vadd.f32 %v1527_v5, %v1055_v42 }
 0x352   :  { %v1045_v36 = vadd.f32 %v1043_v35, %v1644_v6  ;;  %v1833_v44 = vsel %vm1057_vm3, %v1527_v5, %v1056_v43  ;;  %1186 = vmatpush.bf16.msrb.mxu1 %v1486_v26 }
 0x354   :  { %v1024_v37 = vpop.f32.mrf.mxu3  ;;  %v1049_v38 = vsel %vm116_vm0, %v1045_v36, 0.0 }
 0x355   :  { %1050 = vadd.xlane.f32.xlu2 %v1049_v38 }
 0x3bf   :  { %v1048_v45 = vpop.xlane.xlu1 %1047 }
 0x3c0   :  { %v1059_v46 = vmul.f32 %v1833_v44, %v1048_v45 }
 0x3c2   :  { %v1061_v47 = vsub.f32 %v1044_v27, %v1059_v46  ;;  %v1485_v27 = vld [vmem:[%s1889_s8] sm:$0xff]  ;;  %s1255_s8 = sshll.u32 %s1563_s7, 4  ;;  %s1256_s8 = int_to_ptr.vmem [resolvable:$true] %s1255_s8 }
 0x3c3   :  { %1187 = vmatpush.bf16.msrb.mxu1 %v1485_v27 }
 0x3c4   :  { %v1063_v48 = vmul.f32 %v1061_v47, %v1061_v47 }
 0x3c6   :  { %v1065_v6 = vsel %vm116_vm0, %v1063_v48, 0.0 }
 0x3c7   :  { %1066 = vadd.xlane.f32.xlu0 %v1065_v6 }
 0x3c8   :  { %v1051_v49 = vpop.xlane.xlu2 %1050 }
 0x3c9   :  { %v1060_v50 = vmul.f32 %v1833_v44, %v1051_v49 }
 0x3cb   :  { %v1062_v51 = vsub.f32 %v1045_v36, %v1060_v50  ;;  %v1196_v36 = vperm.slane %v1821_v14, 5 }
 0x3cd   :  { %v1064_v52 = vmul.f32 %v1062_v51, %v1062_v51 }
 0x3cf   :  { %v1068_v53 = vsel %vm116_vm0, %v1064_v52, 0.0 }
 0x3d0   :  { %1069 = vadd.xlane.f32.xlu1 %v1068_v53 }
 0x43a   :  { %v1067_v55 = vpop.xlane.xlu0 %1066 }
 0x43b   :  { %v1071_v56 = vmul.f32 %v1067_v55, %v1833_v44 }
 0x43d   :  { %v1073_v57 = vadd.f32 1e-05, %v1071_v56 }
 0x43f   :  { %1528 = vrsqrt.f32 %v1073_v57  ;;  %vm1081_vm5 = vweird.f32 %v1073_v57 }
 0x443   :  { %v1070_v59 = vpop.xlane.xlu1 %1069 }
 0x444   :  { %v1072_v60 = vmul.f32 %v1070_v59, %v1833_v44 }
 0x445   :  { %v1529_v61 = vpop.eup %1528 }
 0x446   :  { %v1076_v62 = vmul.f32 %v1529_v61, %v1073_v57  ;;  %v1074_v63 = vadd.f32 1e-05, %v1072_v60  ;;  %vm1082_vm4 = vweird.f32 %v1529_v61 }
 0x447   :  { %vm1083_vm6 = vmor %vm1081_vm5, %vm1082_vm4 }
 0x448   :  { %v1077_v0 = vmul.f32 %v1529_v61, %v1076_v62  ;;  %1530 = vrsqrt.f32 %v1074_v63  ;;  %vm1091_vm8 = vweird.f32 %v1074_v63 }
 0x44a   :  { %v1078_v1 = vmul.f32 0.5, %v1077_v0 }
 0x44c   :  { %v1079_v2 = vsub.f32 1.5, %v1078_v1 }
 0x44e   :  { %v1531_v3 = vpop.eup %1530  ;;  %v1080_v4 = vmul.f32 %v1529_v61, %v1079_v2 }
 0x44f   :  { %v1086_v7 = vmul.f32 %v1531_v3, %v1074_v63  ;;  %vm1092_vm7 = vweird.f32 %v1531_v3 }
 0x450   :  { %v1084_v9 = vsel %vm1083_vm6, %v1529_v61, %v1080_v4  ;;  %vm1093_vm9 = vmor %vm1091_vm8, %vm1092_vm7  ;;  %v1243_v4 = vperm.slane %v1821_v14, 3 }
 0x451   :  { %v1087_v8 = vmul.f32 %v1531_v3, %v1086_v7  ;;  %v1095_v13 = vmul.f32 %v1084_v9, %v1061_v47 }
 0x453   :  { %v1088_v10 = vmul.f32 0.5, %v1087_v8  ;;  %v1098_v18 = vmul.f32 %v1097_v12, %v1095_v13 }
 0x455   :  { %v1089_v11 = vsub.f32 1.5, %v1088_v10  ;;  %v1101_v21 = vadd.f32 %v1100_v17, %v1098_v18 }
 0x457   :  { %v1090_v15 = vmul.f32 %v1531_v3, %v1089_v11 }
 0x459   :  { %v1094_v16 = vsel %vm1093_vm9, %v1531_v3, %v1090_v15 }
 0x45a   :  { %v1096_v19 = vmul.f32 %v1094_v16, %v1062_v51 }
 0x45c   :  { %v1099_v20 = vmul.f32 %v1097_v12, %v1096_v19 }
 0x45e   :  { %v1102_v22 = vadd.f32 %v1100_v17, %v1099_v20 }
 0x460   :  { %v1103_v23 = vpack.c.bf16 %v1102_v22, %v1101_v21 }
 0x462   :  { %1441 = vmatmul.msk.bf16.vlgmr.msrb.gmra.mxu0 %vm116_vm0, %v1103_v23 }
 0x4df   :  { %v1136_v28 = vpop.f32.mrf.mxu0 }
 0x4e0   :  { %v1137_v30 = vadd.f32 %v1493_v29, %v1136_v28 }
 0x4e2   :  { %v1141_v33 = vmax.f32 %v1137_v30, 0.0 }
 0x4e7   :  { %v1138_v31 = vpop.f32.mrf.mxu0 }
 0x4e8   :  { %v1139_v32 = vadd.f32 %v1493_v29, %v1138_v31 }
 0x4ea   :  { %v1142_v34 = vmax.f32 %v1139_v32, 0.0 }
 0x4ec   :  { %v1143_v35 = vpack.c.bf16 %v1142_v34, %v1141_v33 }
 0x4ee   :  { %1458 = vmatmul.msk.bf16.vlgmr.msrb.gmra.mxu1 %vm1176_vm10, %v1143_v35 }
 0x56b   :  { %v1189_v37 = vpop.f32.mrf.mxu1 }
 0x56c   :  { %v1194_v38 = vadd.f32 %v1189_v37, %v1101_v21 }
 0x56e   :  { %v1197_v39 = vadd.f32 %v1196_v36, %v1194_v38 }
 0x570   :  { %v1199_v5 = vsel %vm116_vm0, %v1197_v39, 0.0 }
 0x571   :  { %1200 = vadd.xlane.f32.xlu2 %v1199_v5 }
 0x573   :  { %v1191_v40 = vpop.f32.mrf.mxu1 }
 0x574   :  { %v1195_v41 = vadd.f32 %v1191_v40, %v1102_v22 }
 0x576   :  { %v1198_v42 = vadd.f32 %v1196_v36, %v1195_v41 }
 0x578   :  { %v1202_v43 = vsel %vm116_vm0, %v1198_v42, 0.0 }
 0x579   :  { %1203 = vadd.xlane.f32.xlu0 %v1202_v43 }
 0x5e4   :  { %v1201_v45 = vpop.xlane.xlu2 %1200 }
 0x5e5   :  { %v1205_v46 = vmul.f32 %v1201_v45, %v1833_v44 }
 0x5e7   :  { %v1207_v47 = vsub.f32 %v1197_v39, %v1205_v46 }
 0x5e9   :  { %v1209_v48 = vmul.f32 %v1207_v47, %v1207_v47 }
 0x5eb   :  { %v1211_v6 = vsel %vm116_vm0, %v1209_v48, 0.0 }
 0x5ec   :  { %1212 = vadd.xlane.f32.xlu1 %v1211_v6  ;;  %v1204_v49 = vpop.xlane.xlu0 %1203 }
 0x5ed   :  { %v1206_v50 = vmul.f32 %v1204_v49, %v1833_v44 }
 0x5ef   :  { %v1208_v51 = vsub.f32 %v1198_v42, %v1206_v50 }
 0x5f1   :  { %v1210_v52 = vmul.f32 %v1208_v51, %v1208_v51 }
 0x5f3   :  { %v1214_v53 = vsel %vm116_vm0, %v1210_v52, 0.0 }
 0x5f4   :  { %1215 = vadd.xlane.f32.xlu2 %v1214_v53 }
 0x65f   :  { %v1213_v54 = vpop.xlane.xlu1 %1212 }
 0x660   :  { %v1217_v55 = vmul.f32 %v1213_v54, %v1833_v44 }
 0x662   :  { %v1219_v56 = vadd.f32 1e-05, %v1217_v55 }
 0x664   :  { %1532 = vrsqrt.f32 %v1219_v56  ;;  %vm1227_vm12 = vweird.f32 %v1219_v56 }
 0x667   :  { %v1216_v57 = vpop.xlane.xlu2 %1215 }
 0x668   :  { %v1218_v58 = vmul.f32 %v1216_v57, %v1833_v44  ;;  %v1246_v44 = vperm.slane %v1821_v14, 4 }
 0x66a   :  { %v1533_v59 = vpop.eup %1532  ;;  %v1220_v60 = vadd.f32 1e-05, %v1218_v58 }
 0x66b   :  { %v1222_v61 = vmul.f32 %v1533_v59, %v1219_v56  ;;  %vm1228_vm11 = vweird.f32 %v1533_v59 }
 0x66c   :  { %1534 = vrsqrt.f32 %v1220_v60  ;;  %vm1229_vm13 = vmor %vm1227_vm12, %vm1228_vm11  ;;  %vm1237_vm15 = vweird.f32 %v1220_v60 }
 0x66d   :  { %v1223_v62 = vmul.f32 %v1533_v59, %v1222_v61 }
 0x66f   :  { %v1224_v63 = vmul.f32 0.5, %v1223_v62 }
 0x671   :  { %v1225_v0 = vsub.f32 1.5, %v1224_v63 }
 0x672   :  { %v1535_v1 = vpop.eup %1534 }
 0x673   :  { %v1226_v2 = vmul.f32 %v1533_v59, %v1225_v0  ;;  %v1232_v3 = vmul.f32 %v1535_v1, %v1220_v60  ;;  %vm1238_vm14 = vweird.f32 %v1535_v1 }
 0x674   :  { %vm1239_vm1 = vmor %vm1237_vm15, %vm1238_vm14 }
 0x675   :  { %v1230_v7 = vsel %vm1229_vm13, %v1533_v59, %v1226_v2  ;;  %v1233_v8 = vmul.f32 %v1535_v1, %v1232_v3 }
 0x676   :  { %v1241_v9 = vmul.f32 %v1230_v7, %v1207_v47 }
 0x677   :  { %v1234_v10 = vmul.f32 0.5, %v1233_v8 }
 0x678   :  { %v1244_v11 = vmul.f32 %v1243_v4, %v1241_v9 }
 0x679   :  { %v1235_v12 = vsub.f32 1.5, %v1234_v10 }
 0x67a   :  { %v1247_v13 = vadd.f32 %v1246_v44, %v1244_v11 }
 0x67b   :  { %v1236_v15 = vmul.f32 %v1535_v1, %v1235_v12 }
 0x67c   :  { %1249 = vst.msk [vmem:[#allocation2] sm:$0xff] %vm116_vm0, %v1247_v13 }
 0x67d   :  { %v1240_v16 = vsel %vm1239_vm1, %v1535_v1, %v1236_v15 }
 0x67e   :  { %v1242_v17 = vmul.f32 %v1240_v16, %v1208_v51 }
 0x680   :  { %v1245_v18 = vmul.f32 %v1243_v4, %v1242_v17 }
 0x682   :  { %v1248_v14 = vadd.f32 %v1246_v44, %v1245_v18 }
 0x684   :  { %1250 = vst.msk [vmem:[#allocation2 + $0x8] sm:$0xff] %vm116_vm0, %v1248_v14 }
 0x685   :  { %1263 = dma.vmem_to_hbm [thread:$0]  %s1256_s8, 256, %s1258_s0, [#allocation3], %s1564_s13, %s1564_s13, %s1565_s4  }
 0x686   :  { %1560 = dma.done.wait [#allocation3], 256  }
 0x687   :  { %1561 = vsyncadd [#allocation3], 4294967040 }
 0x688   :  { %1268 = vsyncpa [#allocation3], 1 }

</bundles_post_ra>
